<compile_context>
chip_gen: v7x
topology: tpu7x:2x2x1
jax: 0.10.0
libtpu: 0.0.40
codegen_flags: <defaults>
</compile_context>

<pallas_src>
import jax
import jax.numpy as jnp
from jax import lax
from jax.experimental import pallas as pl
from jax.experimental.pallas import tpu as pltpu


IN_F = 2          # input features of nn.Linear(2, 8)
HIDDEN = 8        # hidden width
CHUNK = 32        # rows per in-register strip: one (32, 128) f32 operand = 4 vregs
MAX_TILE_STRIPS = 64          # caps double-buffered VMEM at ~6 MiB (v5e-safe)
SMALL_BATCH_PALLAS_THRESHOLD = 16384   # below this, XLA fusion beats kernel overhead


def mlp_kernel(p_ref, x_ref, o_ref):
    # p_ref : SMEM (33,) f32 packed as [w1[0,:8] | w1[1,:8] | b1[:8] | w2[:8] | b2]
    # x_ref : VMEM (2, TS, CHUNK, 128) f32 -- batch dense on sublanes x lanes
    # o_ref : VMEM (TS, CHUNK, 128)    f32
    # Hoist all 33 SMEM scalar reads out of the strip loop.
    w1_0 = [p_ref[j] for j in range(HIDDEN)]
    w1_1 = [p_ref[HIDDEN + j] for j in range(HIDDEN)]
    b1 = [p_ref[2 * HIDDEN + j] for j in range(HIDDEN)]
    w2 = [p_ref[3 * HIDDEN + j] for j in range(HIDDEN)]
    b2 = p_ref[4 * HIDDEN]

    n_strips = o_ref.shape[0]

    def strip(s, carry):
        x0 = x_ref[0, s, :, :]          # (CHUNK, 128)
        x1 = x_ref[1, s, :, :]          # (CHUNK, 128)
        # Init accumulator with b2 + first hidden unit (saves zero-fill + add).
        acc = w2[0] * jnp.maximum(w1_0[0] * x0 + w1_1[0] * x1 + b1[0], 0.0) + b2
        for j in range(1, HIDDEN):
            acc = acc + w2[j] * jnp.maximum(w1_0[j] * x0 + w1_1[j] * x1 + b1[j], 0.0)
        o_ref[s] = acc                  # store ends acc's live range per strip
        return carry

    # TODO(synk): bf16 compute would halve VALU issue on v6e/v7x but relaxes the
    # 1e-5 tolerance; kept f32 for exact parity with the PyTorch module.
    lax.fori_loop(0, n_strips, strip, 0, unroll=True)


def _cdiv(a, b):
    return -(-a // b)


def _round_up(n, m):
    return _cdiv(n, m) * m


def _choose_tiling(batch, tile_strips):
    """Pick (strips per grid block, total strips) with legal (8,128) tiles."""
    rows = _cdiv(batch, 128)                     # 128-lane rows needed
    strips_needed = _cdiv(rows, CHUNK)           # (CHUNK, 128) strips needed
    ts_cap = min(max(int(tile_strips), 1), MAX_TILE_STRIPS)
    if strips_needed > ts_cap:
        ts = ts_cap
    elif strips_needed >= 2:
        # Split so grid >= 2: lets ("parallel",) shard across both TCs on v7x.
        ts = _cdiv(strips_needed, 2)
    else:
        ts = 1
    total = _round_up(strips_needed, ts)
    return ts, total


def my_neural_net_forward(x, w1, b1, w2, b2, *, tile_strips=32, use_pallas=None):
    """Forward of MyNeuralNet on TPU.

    x:  (B, 2)  float32
    w1: (2, 8)  float32   (transposed PyTorch Linear weight)
    b1: (8,)    float32
    w2: (8, 1)  float32   (transposed PyTorch Linear weight)
    b2: (1,)    float32
    returns (B, 1) float32
    """
    B = x.shape[0]
    xf = x.astype(jnp.float32)
    w1f = w1.astype(jnp.float32)
    b1f = b1.astype(jnp.float32)
    w2f = w2.astype(jnp.float32)
    b2f = b2.astype(jnp.float32)

    if use_pallas is None:
        use_pallas = B >= SMALL_BATCH_PALLAS_THRESHOLD
    if not use_pallas:
        # Small-batch fast path: XLA fusion of this 33-weight MLP beats the
        # pallas_call fixed cost + pad/transpose wrapper work.
        return jnp.maximum(xf @ w1f + b1f, 0.0) @ w2f + b2f

    ts, total_strips = _choose_tiling(B, tile_strips)
    bp = total_strips * CHUNK * 128

    # Single fused transpose+pad+reshape to the dense (2, strips, 32, 128) layout.
    # TODO(synk): a feature-major (2, B) producer-side layout would remove this
    # extra HBM pass entirely.
    xt = jnp.pad(xf.T, ((0, 0), (0, bp - B))).reshape(IN_F, total_strips, CHUNK, 128)

    # All parameters packed into one tiny SMEM-resident array (single DMA).
    params = jnp.concatenate([
        w1f.reshape(-1),   # 16: w1[0,:], w1[1,:]
        b1f.reshape(-1),   # 8
        w2f.reshape(-1),   # 8
        b2f.reshape(-1),   # 1
    ])

    grid = (total_strips // ts,)
    yt = pl.pallas_call(
        mlp_kernel,
        out_shape=jax.ShapeDtypeStruct((total_strips, CHUNK, 128), jnp.float32),
        grid=grid,
        in_specs=[
            pl.BlockSpec(memory_space=pltpu.MemorySpace.SMEM),           # params
            pl.BlockSpec((IN_F, ts, CHUNK, 128), lambda i: (0, i, 0, 0)),  # x tile
        ],
        out_specs=pl.BlockSpec((ts, CHUNK, 128), lambda i: (i, 0, 0)),     # y tile
        compiler_params=pltpu.CompilerParams(
            dimension_semantics=("parallel",),
        ),
    )(params, xt)

    # Padded positions hold garbage (sum_j w2_j*relu(b1_j)+b2); slice them off.
    return yt.reshape(bp)[:B].reshape(B, 1)


def init_params(key):
    """Deterministic init matching PyTorch Linear shapes (stored transposed)."""
    k1, k2, k3, k4 = jax.random.split(key, 4)
    lim1 = 1.0 / jnp.sqrt(2.0)
    lim2 = 1.0 / jnp.sqrt(8.0)
    w1 = jax.random.uniform(k1, (2, 8), jnp.float32, -lim1, lim1)
    b1 = jax.random.uniform(k2, (8,), jnp.float32, -lim1, lim1)
    w2 = jax.random.uniform(k3, (8, 1), jnp.float32, -lim2, lim2)
    b2 = jax.random.uniform(k4, (1,), jnp.float32, -lim2, lim2)
    return w1, b1, w2, b2


def _reference(x, w1, b1, w2, b2):
    return jnp.maximum(x @ w1 + b1, 0.0) @ w2 + b2


if __name__ == "__main__":
    key = jax.random.PRNGKey(0)
    kp, k1, k2, k3 = jax.random.split(key, 4)
    w1, b1, w2, b2 = init_params(kp)

    # 1) Tiny batch, Pallas path forced (exercises padding, single grid step).
    x1 = jax.random.normal(k1, (8, 2), dtype=jnp.float32)
    o1 = jax.block_until_ready(
        my_neural_net_forward(x1, w1, b1, w2, b2, use_pallas=True))
    assert o1.shape == (8, 1)
    assert jnp.allclose(o1, _reference(x1, w1, b1, w2, b2), atol=1e-5, rtol=1e-5)

    # 2) Caller-chosen small tile -> multi-step pipelined grid (grid = 2).
    x2 = jax.random.normal(k2, (5000, 2), dtype=jnp.float32)
    o2 = jax.block_until_ready(
        my_neural_net_forward(x2, w1, b1, w2, b2, tile_strips=1, use_pallas=True))
    assert o2.shape == (5000, 1)
    assert jnp.allclose(o2, _reference(x2, w1, b1, w2, b2), atol=1e-5, rtol=1e-5)

    # 3) Default tiling with enough work that the tile is split so grid >= 2
    #    (dual-TC sharding on v7x via dimension_semantics=("parallel",)).
    x3 = jax.random.normal(k3, (8269, 2), dtype=jnp.float32)
    o3 = jax.block_until_ready(
        my_neural_net_forward(x3, w1, b1, w2, b2, use_pallas=True))
    assert o3.shape == (8269, 1)
    assert jnp.allclose(o3, _reference(x3, w1, b1, w2, b2), atol=1e-5, rtol=1e-5)

    # 4) Auto dispatch: small batch takes the XLA fast path.
    o4 = jax.block_until_ready(my_neural_net_forward(x1, w1, b1, w2, b2))
    assert o4.shape == (8, 1)
    assert jnp.allclose(o4, _reference(x1, w1, b1, w2, b2), atol=1e-5, rtol=1e-5)

    print("KERNEL_OK")
</pallas_src>

<mosaic_0001>
module attributes {stable_mosaic.version = 11 : i64} {
  func.func @mlp_kernel(%arg0: i32, %arg1: memref<33xf32, #tpu.memory_space<smem>>, %arg2: memref<2x1x32x128xf32, #tpu.memory_space<vmem>>, %arg3: memref<1x32x128xf32, #tpu.memory_space<vmem>>) attributes {dimension_semantics = [#tpu.dimension_semantics<parallel>], iteration_bounds = array<i64: 1>, scalar_prefetch = 0 : i64, scratch_operands = 0 : i64, tpu.core_type = #tpu.core_type<tc>, window_params = [{transform_indices = @transform_0, window_bounds = array<i64: 33>}, {transform_indices = @transform_1, window_bounds = array<i64: 2, 1, 32, 128>}, {transform_indices = @transform_2, window_bounds = array<i64: 1, 32, 128>}]} {
    %c0 = arith.constant 0 : index
    %0 = memref.load %arg1[%c0] : memref<33xf32, #tpu.memory_space<smem>>
    %c1 = arith.constant 1 : index
    %1 = memref.load %arg1[%c1] : memref<33xf32, #tpu.memory_space<smem>>
    %c2 = arith.constant 2 : index
    %2 = memref.load %arg1[%c2] : memref<33xf32, #tpu.memory_space<smem>>
    %c3 = arith.constant 3 : index
    %3 = memref.load %arg1[%c3] : memref<33xf32, #tpu.memory_space<smem>>
    %c4 = arith.constant 4 : index
    %4 = memref.load %arg1[%c4] : memref<33xf32, #tpu.memory_space<smem>>
    %c5 = arith.constant 5 : index
    %5 = memref.load %arg1[%c5] : memref<33xf32, #tpu.memory_space<smem>>
    %c6 = arith.constant 6 : index
    %6 = memref.load %arg1[%c6] : memref<33xf32, #tpu.memory_space<smem>>
    %c7 = arith.constant 7 : index
    %7 = memref.load %arg1[%c7] : memref<33xf32, #tpu.memory_space<smem>>
    %c8 = arith.constant 8 : index
    %8 = memref.load %arg1[%c8] : memref<33xf32, #tpu.memory_space<smem>>
    %c9 = arith.constant 9 : index
    %9 = memref.load %arg1[%c9] : memref<33xf32, #tpu.memory_space<smem>>
    %c10 = arith.constant 10 : index
    %10 = memref.load %arg1[%c10] : memref<33xf32, #tpu.memory_space<smem>>
    %c11 = arith.constant 11 : index
    %11 = memref.load %arg1[%c11] : memref<33xf32, #tpu.memory_space<smem>>
    %c12 = arith.constant 12 : index
    %12 = memref.load %arg1[%c12] : memref<33xf32, #tpu.memory_space<smem>>
    %c13 = arith.constant 13 : index
    %13 = memref.load %arg1[%c13] : memref<33xf32, #tpu.memory_space<smem>>
    %c14 = arith.constant 14 : index
    %14 = memref.load %arg1[%c14] : memref<33xf32, #tpu.memory_space<smem>>
    %c15 = arith.constant 15 : index
    %15 = memref.load %arg1[%c15] : memref<33xf32, #tpu.memory_space<smem>>
    %c16 = arith.constant 16 : index
    %16 = memref.load %arg1[%c16] : memref<33xf32, #tpu.memory_space<smem>>
    %c17 = arith.constant 17 : index
    %17 = memref.load %arg1[%c17] : memref<33xf32, #tpu.memory_space<smem>>
    %c18 = arith.constant 18 : index
    %18 = memref.load %arg1[%c18] : memref<33xf32, #tpu.memory_space<smem>>
    %c19 = arith.constant 19 : index
    %19 = memref.load %arg1[%c19] : memref<33xf32, #tpu.memory_space<smem>>
    %c20 = arith.constant 20 : index
    %20 = memref.load %arg1[%c20] : memref<33xf32, #tpu.memory_space<smem>>
    %c21 = arith.constant 21 : index
    %21 = memref.load %arg1[%c21] : memref<33xf32, #tpu.memory_space<smem>>
    %c22 = arith.constant 22 : index
    %22 = memref.load %arg1[%c22] : memref<33xf32, #tpu.memory_space<smem>>
    %c23 = arith.constant 23 : index
    %23 = memref.load %arg1[%c23] : memref<33xf32, #tpu.memory_space<smem>>
    %c24 = arith.constant 24 : index
    %24 = memref.load %arg1[%c24] : memref<33xf32, #tpu.memory_space<smem>>
    %c25 = arith.constant 25 : index
    %25 = memref.load %arg1[%c25] : memref<33xf32, #tpu.memory_space<smem>>
    %c26 = arith.constant 26 : index
    %26 = memref.load %arg1[%c26] : memref<33xf32, #tpu.memory_space<smem>>
    %c27 = arith.constant 27 : index
    %27 = memref.load %arg1[%c27] : memref<33xf32, #tpu.memory_space<smem>>
    %c28 = arith.constant 28 : index
    %28 = memref.load %arg1[%c28] : memref<33xf32, #tpu.memory_space<smem>>
    %c29 = arith.constant 29 : index
    %29 = memref.load %arg1[%c29] : memref<33xf32, #tpu.memory_space<smem>>
    %c30 = arith.constant 30 : index
    %30 = memref.load %arg1[%c30] : memref<33xf32, #tpu.memory_space<smem>>
    %c31 = arith.constant 31 : index
    %31 = memref.load %arg1[%c31] : memref<33xf32, #tpu.memory_space<smem>>
    %c32 = arith.constant 32 : index
    %32 = memref.load %arg1[%c32] : memref<33xf32, #tpu.memory_space<smem>>
    %c0_i32 = arith.constant 0 : i32
    %c0_0 = arith.constant 0 : index
    %33 = arith.index_cast %c0_i32 : i32 to index
    %c0_1 = arith.constant 0 : index
    %c0_2 = arith.constant 0 : index
    %34 = vector.load %arg2[%c0_0, %33, %c0_1, %c0_2] : memref<2x1x32x128xf32, #tpu.memory_space<vmem>>, vector<1x1x32x128xf32>
    %35 = vector.shape_cast %34 : vector<1x1x32x128xf32> to vector<32x128xf32>
    %c1_3 = arith.constant 1 : index
    %36 = arith.index_cast %c0_i32 : i32 to index
    %c0_4 = arith.constant 0 : index
    %c0_5 = arith.constant 0 : index
    %37 = vector.load %arg2[%c1_3, %36, %c0_4, %c0_5] : memref<2x1x32x128xf32, #tpu.memory_space<vmem>>, vector<1x1x32x128xf32>
    %38 = vector.shape_cast %37 : vector<1x1x32x128xf32> to vector<32x128xf32>
    %39 = vector.broadcast %0 : f32 to vector<32x128xf32>
    %40 = arith.mulf %39, %35 : vector<32x128xf32>
    %41 = vector.broadcast %8 : f32 to vector<32x128xf32>
    %42 = arith.mulf %41, %38 : vector<32x128xf32>
    %43 = arith.addf %40, %42 : vector<32x128xf32>
    %44 = vector.broadcast %16 : f32 to vector<32x128xf32>
    %45 = arith.addf %43, %44 : vector<32x128xf32>
    %cst = arith.constant 0.000000e+00 : f32
    %46 = vector.broadcast %cst : f32 to vector<32x128xf32>
    %47 = arith.maximumf %45, %46 : vector<32x128xf32>
    %48 = vector.broadcast %24 : f32 to vector<32x128xf32>
    %49 = arith.mulf %48, %47 : vector<32x128xf32>
    %50 = vector.broadcast %32 : f32 to vector<32x128xf32>
    %51 = arith.addf %49, %50 : vector<32x128xf32>
    %52 = vector.broadcast %1 : f32 to vector<32x128xf32>
    %53 = arith.mulf %52, %35 : vector<32x128xf32>
    %54 = vector.broadcast %9 : f32 to vector<32x128xf32>
    %55 = arith.mulf %54, %38 : vector<32x128xf32>
    %56 = arith.addf %53, %55 : vector<32x128xf32>
    %57 = vector.broadcast %17 : f32 to vector<32x128xf32>
    %58 = arith.addf %56, %57 : vector<32x128xf32>
    %cst_6 = arith.constant 0.000000e+00 : f32
    %59 = vector.broadcast %cst_6 : f32 to vector<32x128xf32>
    %60 = arith.maximumf %58, %59 : vector<32x128xf32>
    %61 = vector.broadcast %25 : f32 to vector<32x128xf32>
    %62 = arith.mulf %61, %60 : vector<32x128xf32>
    %63 = arith.addf %51, %62 : vector<32x128xf32>
    %64 = vector.broadcast %2 : f32 to vector<32x128xf32>
    %65 = arith.mulf %64, %35 : vector<32x128xf32>
    %66 = vector.broadcast %10 : f32 to vector<32x128xf32>
    %67 = arith.mulf %66, %38 : vector<32x128xf32>
    %68 = arith.addf %65, %67 : vector<32x128xf32>
    %69 = vector.broadcast %18 : f32 to vector<32x128xf32>
    %70 = arith.addf %68, %69 : vector<32x128xf32>
    %cst_7 = arith.constant 0.000000e+00 : f32
    %71 = vector.broadcast %cst_7 : f32 to vector<32x128xf32>
    %72 = arith.maximumf %70, %71 : vector<32x128xf32>
    %73 = vector.broadcast %26 : f32 to vector<32x128xf32>
    %74 = arith.mulf %73, %72 : vector<32x128xf32>
    %75 = arith.addf %63, %74 : vector<32x128xf32>
    %76 = vector.broadcast %3 : f32 to vector<32x128xf32>
    %77 = arith.mulf %76, %35 : vector<32x128xf32>
    %78 = vector.broadcast %11 : f32 to vector<32x128xf32>
    %79 = arith.mulf %78, %38 : vector<32x128xf32>
    %80 = arith.addf %77, %79 : vector<32x128xf32>
    %81 = vector.broadcast %19 : f32 to vector<32x128xf32>
    %82 = arith.addf %80, %81 : vector<32x128xf32>
    %cst_8 = arith.constant 0.000000e+00 : f32
    %83 = vector.broadcast %cst_8 : f32 to vector<32x128xf32>
    %84 = arith.maximumf %82, %83 : vector<32x128xf32>
    %85 = vector.broadcast %27 : f32 to vector<32x128xf32>
    %86 = arith.mulf %85, %84 : vector<32x128xf32>
    %87 = arith.addf %75, %86 : vector<32x128xf32>
    %88 = vector.broadcast %4 : f32 to vector<32x128xf32>
    %89 = arith.mulf %88, %35 : vector<32x128xf32>
    %90 = vector.broadcast %12 : f32 to vector<32x128xf32>
    %91 = arith.mulf %90, %38 : vector<32x128xf32>
    %92 = arith.addf %89, %91 : vector<32x128xf32>
    %93 = vector.broadcast %20 : f32 to vector<32x128xf32>
    %94 = arith.addf %92, %93 : vector<32x128xf32>
    %cst_9 = arith.constant 0.000000e+00 : f32
    %95 = vector.broadcast %cst_9 : f32 to vector<32x128xf32>
    %96 = arith.maximumf %94, %95 : vector<32x128xf32>
    %97 = vector.broadcast %28 : f32 to vector<32x128xf32>
    %98 = arith.mulf %97, %96 : vector<32x128xf32>
    %99 = arith.addf %87, %98 : vector<32x128xf32>
    %100 = vector.broadcast %5 : f32 to vector<32x128xf32>
    %101 = arith.mulf %100, %35 : vector<32x128xf32>
    %102 = vector.broadcast %13 : f32 to vector<32x128xf32>
    %103 = arith.mulf %102, %38 : vector<32x128xf32>
    %104 = arith.addf %101, %103 : vector<32x128xf32>
    %105 = vector.broadcast %21 : f32 to vector<32x128xf32>
    %106 = arith.addf %104, %105 : vector<32x128xf32>
    %cst_10 = arith.constant 0.000000e+00 : f32
    %107 = vector.broadcast %cst_10 : f32 to vector<32x128xf32>
    %108 = arith.maximumf %106, %107 : vector<32x128xf32>
    %109 = vector.broadcast %29 : f32 to vector<32x128xf32>
    %110 = arith.mulf %109, %108 : vector<32x128xf32>
    %111 = arith.addf %99, %110 : vector<32x128xf32>
    %112 = vector.broadcast %6 : f32 to vector<32x128xf32>
    %113 = arith.mulf %112, %35 : vector<32x128xf32>
    %114 = vector.broadcast %14 : f32 to vector<32x128xf32>
    %115 = arith.mulf %114, %38 : vector<32x128xf32>
    %116 = arith.addf %113, %115 : vector<32x128xf32>
    %117 = vector.broadcast %22 : f32 to vector<32x128xf32>
    %118 = arith.addf %116, %117 : vector<32x128xf32>
    %cst_11 = arith.constant 0.000000e+00 : f32
    %119 = vector.broadcast %cst_11 : f32 to vector<32x128xf32>
    %120 = arith.maximumf %118, %119 : vector<32x128xf32>
    %121 = vector.broadcast %30 : f32 to vector<32x128xf32>
    %122 = arith.mulf %121, %120 : vector<32x128xf32>
    %123 = arith.addf %111, %122 : vector<32x128xf32>
    %124 = vector.broadcast %7 : f32 to vector<32x128xf32>
    %125 = arith.mulf %124, %35 : vector<32x128xf32>
    %126 = vector.broadcast %15 : f32 to vector<32x128xf32>
    %127 = arith.mulf %126, %38 : vector<32x128xf32>
    %128 = arith.addf %125, %127 : vector<32x128xf32>
    %129 = vector.broadcast %23 : f32 to vector<32x128xf32>
    %130 = arith.addf %128, %129 : vector<32x128xf32>
    %cst_12 = arith.constant 0.000000e+00 : f32
    %131 = vector.broadcast %cst_12 : f32 to vector<32x128xf32>
    %132 = arith.maximumf %130, %131 : vector<32x128xf32>
    %133 = vector.broadcast %31 : f32 to vector<32x128xf32>
    %134 = arith.mulf %133, %132 : vector<32x128xf32>
    %135 = arith.addf %123, %134 : vector<32x128xf32>
    %136 = arith.index_cast %c0_i32 : i32 to index
    %c0_13 = arith.constant 0 : index
    %c0_14 = arith.constant 0 : index
    %137 = vector.load %arg3[%136, %c0_13, %c0_14] : memref<1x32x128xf32, #tpu.memory_space<vmem>>, vector<1x32x128xf32>
    %138 = vector.shape_cast %137 : vector<1x32x128xf32> to vector<32x128xf32>
    %139 = vector.shape_cast %135 : vector<32x128xf32> to vector<1x32x128xf32>
    tpu.vector_store %arg3[%136, %c0_13, %c0_14], %139 {strides = array<i32>} : memref<1x32x128xf32, #tpu.memory_space<vmem>>, vector<1x32x128xf32>,
    %c1_i32 = arith.constant 1 : i32
    return
  }
  func.func @transform_0(%arg0: i32) -> i32 {
    %c0_i32 = arith.constant 0 : i32
    %c0_i32_0 = arith.constant 0 : i32
    return %c0_i32 : i32
  }
  func.func @transform_1(%arg0: i32) -> (i32, i32, i32, i32) {
    %c0_i32 = arith.constant 0 : i32
    %c0_i32_0 = arith.constant 0 : i32
    %c0_i32_1 = arith.constant 0 : i32
    %c0_i32_2 = arith.constant 0 : i32
    return %c0_i32, %arg0, %c0_i32_0, %c0_i32_1 : i32, i32, i32, i32
  }
  func.func @transform_2(%arg0: i32) -> (i32, i32, i32) {
    %c0_i32 = arith.constant 0 : i32
    %c0_i32_0 = arith.constant 0 : i32
    %c0_i32_1 = arith.constant 0 : i32
    return %arg0, %c0_i32, %c0_i32_0 : i32, i32, i32
  }
}

</mosaic_0001>

<bundles_post_ra>
// kernel: tpu_custom_call.1
= control target key start
LH: loop header
LB: loop body
LE: loop exit
PB: predicated region body
PF: predicated region fallthrough
CT: control target
= control target key end

     0   :  { %7 = vsyncpa [#allocation5], 0  ;;  %s827_s0 = inlined_call_operand.hbm [shape: f32[33], index: 0, kind: input, shape index: {}]   ;;  %s828_s1 = inlined_call_operand.hbm [shape: f32[2,1,32,128], index: 1, kind: input, shape index: {}]   ;;  %s829_s2 = inlined_call_operand.hbm [shape: f32[1,32,128], index: 2, kind: output, shape index: {}]  }
   0x1   :  { %8 = vsyncpa [#allocation3], 0 }
   0x2   :  { %9 = vsyncpa [#allocation4], 0  ;;  %s395_s11 = scalar_lea.hbm %s827_s0, 16 }
   0x3   :  { %p396_p0 = scmp.ne.s32.totalorder %s827_s0, %s395_s11  ;;  %p399_p1 = scmp.lt.u32.totalorder %s395_s11, %s827_s0 }
   0x5   :  { %p401_p2 = pnand %p399_p1, %p396_p0 }
   0x7   :  { %404 = shalt.err (!%p401_p2)
}
   0x8   :  { %s455_s16 = smov [#allocation2]   ;;  %s456_s19 = smov [#allocation6]  }
   0x9   :  { %17 = dma.hbm_to_smem %s827_s0, 16, %s455_s16, [#allocation5]  }
   0xa   :  { %s23_s20 = sshll.u32 %s456_s19, 4  ;;  %s405_s23 = scalar_lea.hbm %s828_s1, 1024  ;;  %s24_s20 = int_to_ptr.vmem [resolvable:$true] %s23_s20 }
   0xb   :  { %p406_p3 = scmp.ne.s32.totalorder %s828_s1, %s405_s23  ;;  %p409_p4 = scmp.lt.u32.totalorder %s405_s23, %s828_s1 }
   0xd   :  { %p411_p5 = pnand %p409_p4, %p406_p3 }
   0xf   :  { %414 = shalt.err (!%p411_p5)
}
  0x10   :  { %s415_s28 = scalar_lea.vmem %s24_s20, 1024  ;;  %p420_p7 = scmp.lt.s32.totalorder %s24_s20, %s24_s20 }
  0x11   :  { %p416_p6 = scmp.ne.s32.totalorder %s24_s20, %s415_s28  ;;  %p421_p8 = scmp.lt.s32.totalorder %s415_s28, %s415_s28 }
  0x13   :  { %p422_p9 = por %p421_p8, %p420_p7 }
  0x15   :  { %p423_p10 = pnand %p422_p9, %p416_p6 }
  0x17   :  { %426 = shalt.err (!%p423_p10)
}
  0x18   :  { %s457_s0 = smov 128   ;;  %s458_s29 = smov 8  }
  0x19   :  { %29 = dma.hbm_to_vmem [thread:$0]  %s828_s1, 1024, %s24_s20, [#allocation3], %s457_s0, %s457_s0, %s458_s29  }
  0x1a   :  { %449 = dma.done.wait [#allocation5], 16  }
  0x1b   :  { %450 = vsyncadd [#allocation5], 4294967280 }
  0x1c   :  { %451 = dma.done.wait [#allocation3], 1024  }
  0x1d   :  { %452 = vsyncadd [#allocation3], 4294966272 }
  0x1e   :  { %36 = sfence }
  0x1f   :  { %s37_s4 = sld [smem:[#allocation2]]  ;;  %s358_s5 = sld [smem:[#allocation2 + $0x1]]  ;;  %v70_v0 = vld [vmem:[#allocation6] sm:$0xff] }
  0x20   :  { %s359_s6 = sld [smem:[#allocation2 + $0x2]]  ;;  %s360_s7 = sld [smem:[#allocation2 + $0x3]]  ;;  %v526_v7 = vld [vmem:[#allocation6 + $0x20] sm:$0xff] }
  0x21   :  { %s361_s8 = sld [smem:[#allocation2 + $0x4]]  ;;  %s362_s9 = sld [smem:[#allocation2 + $0x5]] }
  0x22   :  { %s363_s10 = sld [smem:[#allocation2 + $0x6]]  ;;  %s364_s11 = sld [smem:[#allocation2 + $0x7]] }
  0x23   :  { %s365_s12 = sld [smem:[#allocation2 + $0x8]]  ;;  %s366_s13 = sld [smem:[#allocation2 + $0x9]] }
  0x24   :  { %s502_s14 = sld [smem:[#allocation2 + $0xa]]  ;;  %s504_s15 = sld [smem:[#allocation2 + $0xb]] }
  0x25   :  { %s506_s1 = sld [smem:[#allocation2 + $0xc]]  ;;  %s508_s16 = sld [smem:[#allocation2 + $0xd]]  ;;  %v510_v1 = vstv %s37_s4  ;;  %v512_v2 = vstv %s358_s5 }
  0x26   :  { %s514_s17 = sld [smem:[#allocation2 + $0xe]]  ;;  %v80_v3 = vmul.f32 %v510_v1, %v70_v0  ;;  %v113_v4 = vmul.f32 %v512_v2, %v70_v0  ;;  %v518_v5 = vstv %s359_s6  ;;  %v520_v6 = vstv %s360_s7  ;;  %s522_s18 = sld [smem:[#allocation2 + $0x10]] }
  0x27   :  { %s524_s19 = sld [smem:[#allocation2 + $0x11]]  ;;  %v145_v8 = vmul.f32 %v518_v5, %v70_v0  ;;  %v177_v9 = vmul.f32 %v520_v6, %v70_v0  ;;  %v530_v10 = vstv %s361_s8  ;;  %v532_v11 = vstv %s362_s9  ;;  %s534_s20 = sld [smem:[#allocation2 + $0x12]] }
  0x28   :  { %s536_s21 = sld [smem:[#allocation2 + $0x13]]  ;;  %v209_v12 = vmul.f32 %v530_v10, %v70_v0  ;;  %v241_v13 = vmul.f32 %v532_v11, %v70_v0  ;;  %v540_v14 = vstv %s363_s10  ;;  %v542_v15 = vstv %s364_s11  ;;  %s544_s22 = sld [smem:[#allocation2 + $0x14]] }
  0x29   :  { %s546_s23 = sld [smem:[#allocation2 + $0x15]]  ;;  %v548_v16 = vstv %s365_s12  ;;  %v550_v17 = vstv %s366_s13  ;;  %v553_v18 = vmul.f32 %v540_v14, %v70_v0  ;;  %v556_v19 = vmul.f32 %v542_v15, %v70_v0  ;;  %s558_s24 = sld [smem:[#allocation2 + $0xf]] }
  0x2a   :  { %s560_s25 = sld [smem:[#allocation2 + $0x16]]  ;;  %v85_v20 = vmul.f32 %v548_v16, %v526_v7  ;;  %v118_v21 = vmul.f32 %v550_v17, %v526_v7  ;;  %v567_v22 = vstv %s502_s14  ;;  %v570_v23 = vstv %s504_s15  ;;  %s572_s26 = sld [smem:[#allocation2 + $0x18]] }
  0x2b   :  { %s574_s27 = sld [smem:[#allocation2 + $0x19]]  ;;  %v150_v24 = vmul.f32 %v567_v22, %v526_v7  ;;  %v182_v25 = vmul.f32 %v570_v23, %v526_v7  ;;  %v581_v26 = vstv %s506_s1  ;;  %v584_v27 = vstv %s508_s16  ;;  %s586_s28 = sld [smem:[#allocation2 + $0x1a]] }
  0x2c   :  { %s588_s30 = sld [smem:[#allocation2 + $0x1b]]  ;;  %v89_v28 = vadd.f32 %v85_v20, %v80_v3  ;;  %v122_v29 = vadd.f32 %v118_v21, %v113_v4  ;;  %v214_v30 = vmul.f32 %v581_v26, %v526_v7  ;;  %v246_v31 = vmul.f32 %v584_v27, %v526_v7  ;;  %s594_s3 = sld [smem:[#allocation2 + $0x1c]] }
  0x2d   :  { %s596_s4 = sld [smem:[#allocation2 + $0x1d]]  ;;  %v599_v32 = vstv %s522_s18  ;;  %v602_v33 = vstv %s524_s19  ;;  %v154_v34 = vadd.f32 %v150_v24, %v145_v8  ;;  %v186_v35 = vadd.f32 %v182_v25, %v177_v9  ;;  %s604_s5 = sld [smem:[#allocation2 + $0x17]]  ;;  %v71_v9 = vld [vmem:[#allocation6 + $0x8] sm:$0xff] }
  0x2e   :  { %s606_s6 = sld [smem:[#allocation2 + $0x1e]]  ;;  %v94_v36 = vadd.f32 %v599_v32, %v89_v28  ;;  %v127_v37 = vadd.f32 %v602_v33, %v122_v29  ;;  %v611_v38 = vstv %s534_s20  ;;  %v614_v39 = vstv %s536_s21  ;;  %s616_s7 = sld [smem:[#allocation2 + $0x1f]] }
  0x2f   :  { %s389_s8 = sld [smem:[#allocation2 + $0x20]]  ;;  %v159_v40 = vadd.f32 %v611_v38, %v154_v34  ;;  %v191_v41 = vadd.f32 %v614_v39, %v186_v35  ;;  %v218_v42 = vadd.f32 %v214_v30, %v209_v12  ;;  %v621_v43 = vstv %s544_s22  ;;  %v76_v12 = vld [vmem:[#allocation6 + $0x28] sm:$0xff]  ;;  %s459_s9 = smov [#allocation7]  }
  0x30   :  { %v98_v44 = vmax.f32 %v94_v36, 0.0  ;;  %v131_v45 = vmax.f32 %v127_v37, 0.0  ;;  %v250_v46 = vadd.f32 %v246_v31, %v241_v13  ;;  %v624_v47 = vstv %s546_s23  ;;  %s345_s10 = sshll.u32 %s459_s9, 4  ;;  %s346_s10 = int_to_ptr.vmem [resolvable:$true] %s345_s10 }
  0x31   :  { %v627_v48 = vstv %s572_s26  ;;  %v630_v49 = vstv %s574_s27  ;;  %v163_v50 = vmax.f32 %v159_v40, 0.0  ;;  %v195_v51 = vmax.f32 %v191_v41, 0.0  ;;  %s427_s11 = scalar_lea.vmem %s346_s10, 512  ;;  %p432_p12 = scmp.lt.s32.totalorder %s346_s10, %s346_s10 }
  0x32   :  { %v103_v52 = vmul.f32 %v627_v48, %v98_v44  ;;  %v136_v53 = vmul.f32 %v630_v49, %v131_v45  ;;  %v635_v54 = vstv %s586_s28  ;;  %v638_v55 = vstv %s588_s30  ;;  %p428_p11 = scmp.ne.s32.totalorder %s346_s10, %s427_s11  ;;  %p433_p13 = scmp.lt.s32.totalorder %s427_s11, %s427_s11 }
  0x33   :  { %v168_v56 = vmul.f32 %v635_v54, %v163_v50  ;;  %v200_v57 = vmul.f32 %v638_v55, %v195_v51  ;;  %v223_v58 = vadd.f32 %v621_v43, %v218_v42  ;;  %v644_v59 = vstv %s594_s3 }
  0x34   :  { %v255_v60 = vadd.f32 %v624_v47, %v250_v46  ;;  %v648_v61 = vstv %s596_s4  ;;  %v651_v62 = vstv %s514_s17  ;;  %v654_v63 = vstv %s560_s25  ;;  %p434_p0 = por %p433_p13, %p432_p12 }
  0x35   :  { %v656_v0 = vstv %s389_s8  ;;  %v227_v3 = vmax.f32 %v223_v58, 0.0  ;;  %v278_v4 = vmul.f32 %v651_v62, %v526_v7  ;;  %v661_v8 = vstv %s606_s6 }
  0x36   :  { %v108_v13 = vadd.f32 %v656_v0, %v103_v52  ;;  %v259_v20 = vmax.f32 %v255_v60, 0.0  ;;  %v665_v21 = vstv %s558_s24  ;;  %v668_v24 = vstv %s604_s5  ;;  %p435_p1 = pnand %p434_p0, %p428_p11 }
  0x37   :  { %v232_v25 = vmul.f32 %v644_v59, %v227_v3  ;;  %v282_v28 = vadd.f32 %v278_v4, %v553_v18  ;;  %v310_v29 = vmul.f32 %v665_v21, %v526_v7  ;;  %v675_v30 = vstv %s616_s7 }
  0x38   :  { %v140_v31 = vadd.f32 %v136_v53, %v108_v13  ;;  %v264_v34 = vmul.f32 %v648_v61, %v259_v20  ;;  %v81_v35 = vmul.f32 %v510_v1, %v71_v9  ;;  %v86_v36 = vmul.f32 %v548_v16, %v76_v12 }
  0x39   :  { %v287_v37 = vadd.f32 %v654_v63, %v282_v28  ;;  %v314_v40 = vadd.f32 %v310_v29, %v556_v19  ;;  %v114_v41 = vmul.f32 %v512_v2, %v71_v9  ;;  %v119_v18 = vmul.f32 %v550_v17, %v76_v12 }
  0x3a   :  { %v172_v42 = vadd.f32 %v168_v56, %v140_v31  ;;  %v90_v44 = vadd.f32 %v86_v36, %v81_v35  ;;  %v146_v7 = vmul.f32 %v518_v5, %v71_v9  ;;  %v151_v45 = vmul.f32 %v567_v22, %v76_v12 }
  0x3b   :  { %v291_v46 = vmax.f32 %v287_v37, 0.0  ;;  %v319_v50 = vadd.f32 %v668_v24, %v314_v40  ;;  %v123_v51 = vadd.f32 %v119_v18, %v114_v41  ;;  %v178_v52 = vmul.f32 %v520_v6, %v71_v9 }
  0x3c   :  { %v204_v53 = vadd.f32 %v200_v57, %v172_v42  ;;  %v95_v58 = vadd.f32 %v599_v32, %v90_v44  ;;  %v155_v19 = vadd.f32 %v151_v45, %v146_v7  ;;  %v183_v60 = vmul.f32 %v570_v23, %v76_v12 }
  0x3d   :  { %v296_v3 = vmul.f32 %v661_v8, %v291_v46  ;;  %v323_v56 = vmax.f32 %v319_v50, 0.0  ;;  %v128_v4 = vadd.f32 %v602_v33, %v123_v51  ;;  %v210_v13 = vmul.f32 %v530_v10, %v71_v9 }
  0x3e   :  { %v236_v20 = vadd.f32 %v232_v25, %v204_v53  ;;  %v99_v28 = vmax.f32 %v95_v58, 0.0  ;;  %v160_v29 = vadd.f32 %v611_v38, %v155_v19  ;;  %v187_v31 = vadd.f32 %v183_v60, %v178_v52  ;;  %v704_v53 = vld [vmem:[#allocation6 + $0x10] sm:$0xff] }
  0x3f   :  { %v328_v35 = vmul.f32 %v675_v30, %v323_v56  ;;  %v132_v57 = vmax.f32 %v128_v4, 0.0  ;;  %v215_v36 = vmul.f32 %v581_v26, %v76_v12  ;;  %v242_v37 = vmul.f32 %v532_v11, %v71_v9  ;;  %v709_v56 = vld [vmem:[#allocation6 + $0x30] sm:$0xff] }
  0x40   :  { %v268_v40 = vadd.f32 %v264_v34, %v236_v20  ;;  %v104_v41 = vmul.f32 %v627_v48, %v99_v28  ;;  %v164_v18 = vmax.f32 %v160_v29, 0.0  ;;  %v192_v42 = vadd.f32 %v614_v39, %v187_v31 }
  0x41   :  { %v137_v44 = vmul.f32 %v630_v49, %v132_v57  ;;  %v219_v25 = vadd.f32 %v215_v36, %v210_v13  ;;  %v247_v7 = vmul.f32 %v584_v27, %v76_v12  ;;  %v274_v45 = vmul.f32 %v540_v14, %v71_v9 }
  0x42   :  { %v300_v46 = vadd.f32 %v296_v3, %v268_v40  ;;  %v109_v50 = vadd.f32 %v656_v0, %v104_v41  ;;  %v169_v51 = vmul.f32 %v635_v54, %v164_v18  ;;  %v196_v52 = vmax.f32 %v192_v42, 0.0 }
  0x43   :  { %v224_v34 = vadd.f32 %v621_v43, %v219_v25  ;;  %v251_v58 = vadd.f32 %v247_v7, %v242_v37  ;;  %v279_v19 = vmul.f32 %v651_v62, %v76_v12  ;;  %v306_v60 = vmul.f32 %v542_v15, %v71_v9 }
  0x44   :  { %v332_v4 = vadd.f32 %v328_v35, %v300_v46  ;;  %v141_v13 = vadd.f32 %v137_v44, %v109_v50  ;;  %v201_v3 = vmul.f32 %v638_v55, %v196_v52  ;;  %v311_v20 = vmul.f32 %v665_v21, %v76_v12 }
  0x45   :  { %v228_v28 = vmax.f32 %v224_v34, 0.0  ;;  %v256_v29 = vadd.f32 %v624_v47, %v251_v58  ;;  %v283_v31 = vadd.f32 %v279_v19, %v274_v45  ;;  %v82_v57 = vmul.f32 %v510_v1, %v704_v53 }
  0x46   :  { %336 = vst [vmem:[#allocation7] sm:$0xff] %v332_v4  ;;  %v173_v36 = vadd.f32 %v169_v51, %v141_v13  ;;  %v315_v37 = vadd.f32 %v311_v20, %v306_v60  ;;  %v87_v9 = vmul.f32 %v548_v16, %v709_v56  ;;  %v115_v35 = vmul.f32 %v512_v2, %v704_v53 }
  0x47   :  { %v233_v40 = vmul.f32 %v644_v59, %v228_v28  ;;  %v260_v41 = vmax.f32 %v256_v29, 0.0  ;;  %v288_v12 = vadd.f32 %v654_v63, %v283_v31  ;;  %v120_v18 = vmul.f32 %v550_v17, %v709_v56 }
  0x48   :  { %v205_v42 = vadd.f32 %v201_v3, %v173_v36  ;;  %v320_v44 = vadd.f32 %v668_v24, %v315_v37  ;;  %v91_v25 = vadd.f32 %v87_v9, %v82_v57  ;;  %v147_v7 = vmul.f32 %v518_v5, %v704_v53 }
  0x49   :  { %v265_v45 = vmul.f32 %v648_v61, %v260_v41  ;;  %v292_v46 = vmax.f32 %v288_v12, 0.0  ;;  %v124_v50 = vadd.f32 %v120_v18, %v115_v35  ;;  %v152_v51 = vmul.f32 %v567_v22, %v709_v56 }
  0x4a   :  { %v237_v52 = vadd.f32 %v233_v40, %v205_v42  ;;  %v324_v34 = vmax.f32 %v320_v44, 0.0  ;;  %v96_v58 = vadd.f32 %v599_v32, %v91_v25  ;;  %v179_v19 = vmul.f32 %v520_v6, %v704_v53 }
  0x4b   :  { %v297_v60 = vmul.f32 %v661_v8, %v292_v46  ;;  %v129_v4 = vadd.f32 %v602_v33, %v124_v50  ;;  %v156_v13 = vadd.f32 %v152_v51, %v147_v7  ;;  %v184_v3 = vmul.f32 %v570_v23, %v709_v56  ;;  %v753_v51 = vld [vmem:[#allocation6 + $0x18] sm:$0xff] }
  0x4c   :  { %v269_v20 = vadd.f32 %v265_v45, %v237_v52  ;;  %v329_v28 = vmul.f32 %v675_v30, %v324_v34  ;;  %v100_v29 = vmax.f32 %v96_v58, 0.0  ;;  %v211_v31 = vmul.f32 %v530_v10, %v704_v53 }
  0x4d   :  { %v133_v57 = vmax.f32 %v129_v4, 0.0  ;;  %v161_v36 = vadd.f32 %v611_v38, %v156_v13  ;;  %v188_v37 = vadd.f32 %v184_v3, %v179_v19  ;;  %v216_v9 = vmul.f32 %v581_v26, %v709_v56 }
  0x4e   :  { %v301_v35 = vadd.f32 %v297_v60, %v269_v20  ;;  %v105_v40 = vmul.f32 %v627_v48, %v100_v29  ;;  %v243_v41 = vmul.f32 %v532_v11, %v704_v53  ;;  %v248_v12 = vmul.f32 %v584_v27, %v709_v56  ;;  %v78_v60 = vld [vmem:[#allocation6 + $0x38] sm:$0xff] }
  0x4f   :  { %v138_v18 = vmul.f32 %v630_v49, %v133_v57  ;;  %v165_v42 = vmax.f32 %v161_v36, 0.0  ;;  %v193_v44 = vadd.f32 %v614_v39, %v188_v37  ;;  %v220_v25 = vadd.f32 %v216_v9, %v211_v31 }
  0x50   :  { %v333_v7 = vadd.f32 %v329_v28, %v301_v35  ;;  %v110_v45 = vadd.f32 %v656_v0, %v105_v40  ;;  %v252_v46 = vadd.f32 %v248_v12, %v243_v41  ;;  %v275_v50 = vmul.f32 %v540_v14, %v704_v53 }
  0x51   :  { %v170_v52 = vmul.f32 %v635_v54, %v165_v42  ;;  %v197_v34 = vmax.f32 %v193_v44, 0.0  ;;  %v225_v58 = vadd.f32 %v621_v43, %v220_v25  ;;  %v280_v19 = vmul.f32 %v651_v62, %v709_v56 }
  0x52   :  { %337 = vst [vmem:[#allocation7 + $0x8] sm:$0xff] %v333_v7  ;;  %v142_v4 = vadd.f32 %v138_v18, %v110_v45  ;;  %v257_v13 = vadd.f32 %v624_v47, %v252_v46  ;;  %v307_v3 = vmul.f32 %v542_v15, %v704_v53  ;;  %v312_v20 = vmul.f32 %v665_v21, %v709_v56 }
  0x53   :  { %v202_v28 = vmul.f32 %v638_v55, %v197_v34  ;;  %v229_v29 = vmax.f32 %v225_v58, 0.0  ;;  %v284_v31 = vadd.f32 %v280_v19, %v275_v50  ;;  %v83_v57 = vmul.f32 %v510_v1, %v753_v51 }
  0x54   :  { %v174_v36 = vadd.f32 %v170_v52, %v142_v4  ;;  %v261_v37 = vmax.f32 %v257_v13, 0.0  ;;  %v316_v9 = vadd.f32 %v312_v20, %v307_v3  ;;  %v88_v35 = vmul.f32 %v548_v16, %v78_v60 }
  0x55   :  { %v234_v40 = vmul.f32 %v644_v59, %v229_v29  ;;  %v289_v41 = vadd.f32 %v654_v63, %v284_v31  ;;  %v116_v53 = vmul.f32 %v512_v2, %v753_v51  ;;  %v121_v56 = vmul.f32 %v550_v17, %v78_v60 }
  0x56   :  { %v206_v12 = vadd.f32 %v202_v28, %v174_v36  ;;  %v266_v18 = vmul.f32 %v648_v61, %v261_v37  ;;  %v321_v42 = vadd.f32 %v668_v24, %v316_v9  ;;  %v92_v1 = vadd.f32 %v88_v35, %v83_v57 }
  0x57   :  { %v293_v44 = vmax.f32 %v289_v41, 0.0  ;;  %v125_v25 = vadd.f32 %v121_v56, %v116_v53  ;;  %v148_v16 = vmul.f32 %v518_v5, %v753_v51  ;;  %v153_v7 = vmul.f32 %v567_v22, %v78_v60 }
  0x58   :  { %v238_v45 = vadd.f32 %v234_v40, %v206_v12  ;;  %v325_v46 = vmax.f32 %v321_v42, 0.0  ;;  %v97_v50 = vadd.f32 %v599_v32, %v92_v1  ;;  %v180_v2 = vmul.f32 %v520_v6, %v753_v51 }
  0x59   :  { %v298_v17 = vmul.f32 %v661_v8, %v293_v44  ;;  %v130_v52 = vadd.f32 %v602_v33, %v125_v25  ;;  %v157_v34 = vadd.f32 %v153_v7, %v148_v16  ;;  %v185_v58 = vmul.f32 %v570_v23, %v78_v60 }
  0x5a   :  { %v270_v19 = vadd.f32 %v266_v18, %v238_v45  ;;  %v330_v4 = vmul.f32 %v675_v30, %v325_v46  ;;  %v101_v5 = vmax.f32 %v97_v50, 0.0  ;;  %v212_v22 = vmul.f32 %v530_v10, %v753_v51 }
  0x5b   :  { %v134_v13 = vmax.f32 %v130_v52, 0.0  ;;  %v162_v32 = vadd.f32 %v611_v38, %v157_v34  ;;  %v189_v3 = vadd.f32 %v185_v58, %v180_v2  ;;  %v217_v6 = vmul.f32 %v581_v26, %v78_v60 }
  0x5c   :  { %v302_v20 = vadd.f32 %v298_v17, %v270_v19  ;;  %v106_v28 = vmul.f32 %v627_v48, %v101_v5  ;;  %v244_v33 = vmul.f32 %v532_v11, %v753_v51  ;;  %v249_v23 = vmul.f32 %v584_v27, %v78_v60 }
  0x5d   :  { %v139_v29 = vmul.f32 %v630_v49, %v134_v13  ;;  %v166_v31 = vmax.f32 %v162_v32, 0.0  ;;  %v194_v57 = vadd.f32 %v614_v39, %v189_v3  ;;  %v221_v10 = vadd.f32 %v217_v6, %v212_v22 }
  0x5e   :  { %v334_v36 = vadd.f32 %v330_v4, %v302_v20  ;;  %v111_v38 = vadd.f32 %v656_v0, %v106_v28  ;;  %v253_v37 = vadd.f32 %v249_v23, %v244_v33  ;;  %v276_v26 = vmul.f32 %v540_v14, %v753_v51 }
  0x5f   :  { %v171_v48 = vmul.f32 %v635_v54, %v166_v31  ;;  %v198_v9 = vmax.f32 %v194_v57, 0.0  ;;  %v226_v11 = vadd.f32 %v621_v43, %v221_v10  ;;  %v281_v27 = vmul.f32 %v651_v62, %v78_v60 }
  0x60   :  { %338 = vst [vmem:[#allocation7 + $0x10] sm:$0xff] %v334_v36  ;;  %v143_v49 = vadd.f32 %v139_v29, %v111_v38  ;;  %v258_v35 = vadd.f32 %v624_v47, %v253_v37  ;;  %v308_v39 = vmul.f32 %v542_v15, %v753_v51  ;;  %v313_v0 = vmul.f32 %v665_v21, %v78_v60 }
  0x61   :  { %v203_v40 = vmul.f32 %v638_v55, %v198_v9  ;;  %v230_v41 = vmax.f32 %v226_v11, 0.0  ;;  %v285_v14 = vadd.f32 %v281_v27, %v276_v26 }
  0x62   :  { %v175_v53 = vadd.f32 %v171_v48, %v143_v49  ;;  %v262_v54 = vmax.f32 %v258_v35, 0.0  ;;  %v317_v56 = vadd.f32 %v313_v0, %v308_v39 }
  0x63   :  { %v235_v43 = vmul.f32 %v644_v59, %v230_v41  ;;  %v290_v62 = vadd.f32 %v654_v63, %v285_v14 }
  0x64   :  { %v207_v12 = vadd.f32 %v203_v40, %v175_v53  ;;  %v267_v18 = vmul.f32 %v648_v61, %v262_v54  ;;  %v322_v47 = vadd.f32 %v668_v24, %v317_v56 }
  0x65   :  { %v294_v42 = vmax.f32 %v290_v62, 0.0 }
  0x66   :  { %v239_v15 = vadd.f32 %v235_v43, %v207_v12  ;;  %v326_v51 = vmax.f32 %v322_v47, 0.0 }
  0x67   :  { %v299_v21 = vmul.f32 %v661_v8, %v294_v42 }
  0x68   :  { %v271_v55 = vadd.f32 %v267_v18, %v239_v15  ;;  %v331_v60 = vmul.f32 %v675_v30, %v326_v51 }
  0x6a   :  { %v303_v1 = vadd.f32 %v299_v21, %v271_v55 }
  0x6c   :  { %v335_v44 = vadd.f32 %v331_v60, %v303_v1 }
  0x6e   :  { %339 = vst [vmem:[#allocation7 + $0x18] sm:$0xff] %v335_v44 }
  0x6f   :  { %438 = shalt.err (!%p435_p1)
}
  0x70   :  { %s439_s14 = scalar_lea.hbm %s829_s2, 512 }
  0x71   :  { %p440_p2 = scmp.ne.s32.totalorder %s829_s2, %s439_s14  ;;  %p443_p3 = scmp.lt.u32.totalorder %s439_s14, %s829_s2 }
  0x73   :  { %p445_p4 = pnand %p443_p3, %p440_p2 }
  0x75   :  { %448 = shalt.err (!%p445_p4)
}
  0x76   :  { %351 = dma.vmem_to_hbm [thread:$0]  %s346_s10, 512, %s829_s2, [#allocation4], %s457_s0, %s457_s0, %s458_s29  }
  0x77   :  { %453 = dma.done.wait [#allocation4], 512  }
  0x78   :  { %454 = vsyncadd [#allocation4], 4294966784 }
  0x79   :  { %355 = vsyncpa [#allocation3], 1 }
  0x7a   :  { %356 = vsyncpa [#allocation4], 1 }
  0x7b   :  { %357 = vsyncpa [#allocation5], 1 }

</bundles_post_ra>
